<compile_context>
chip_gen: v5e
topology: v5e:2x2
jax: 0.10.0
libtpu: 0.0.40
codegen_flags: <defaults>
</compile_context>

<pallas_src>
import functools

import jax
import jax.numpy as jnp
from jax.experimental import pallas as pl
from jax.experimental.pallas import tpu as pltpu


def _deep_table3_kernel(x_ref, w1_ref, w2_ref, w3_ref, o_ref, *, in_channels):
    # ---- fc1 on the VPU: (B, C) x (C, H1) with C tiny (== 4) ----------------
    x = x_ref[...].astype(jnp.float32)              # (B, C)
    w1 = w1_ref[...].astype(jnp.float32)            # (C, H1)
    h1 = x[:, 0:1] * w1[0:1, :]
    for k in range(1, in_channels):                  # static unroll: C broadcast FMAs
        h1 = h1 + x[:, k:k + 1] * w1[k:k + 1, :]

    # ---- fc2 on the MXU: (B, H1) @ (H1, H2), bf16 operands, f32 accumulation -
    z = jnp.dot(h1.astype(w2_ref.dtype), w2_ref[...],
                preferred_element_type=jnp.float32)

    # ---- softmax over the feature axis (PyTorch F.softmax default dim=1) -----
    z = z - jnp.max(z, axis=-1, keepdims=True)
    e = jnp.exp(z)
    p = e / jnp.sum(e, axis=-1, keepdims=True)

    # ---- fc3 on the MXU: (B, H2) @ (H2, C_out), f32 accumulation -------------
    y = jnp.dot(p.astype(w3_ref.dtype), w3_ref[...],
                preferred_element_type=jnp.float32)
    o_ref[...] = y.astype(o_ref.dtype)


def deep_table3_forward(x, params):
    """x: (B, in_channels). params: (w1, w2, w3) stored as (in, out).
    Returns (B, out_channels) float32."""
    w1, w2, w3 = params
    B = x.shape[0]
    x = x.reshape(B, -1).astype(jnp.float32)
    in_channels = x.shape[1]
    assert w1.shape[0] == in_channels, (w1.shape, in_channels)
    out_channels = w3.shape[1]

    vmem = pl.BlockSpec(memory_space=pltpu.VMEM)
    kernel = functools.partial(_deep_table3_kernel, in_channels=in_channels)
    return pl.pallas_call(
        kernel,
        out_shape=jax.ShapeDtypeStruct((B, out_channels), jnp.float32),
        in_specs=[vmem] * 4,
        out_specs=vmem,
    )(x, w1, w2, w3)


def init_params(key, in_channels=4, out_channels=4, num_hidden1=200,
                num_hidden2=100, *, faithful=True, dtype=jnp.bfloat16):
    """Weights stored transposed as (in, out) relative to PyTorch's (out, in).

    faithful=True mirrors the module's init (fc1 and fc3 zeroed, fc2 default
    nn.Linear uniform init); faithful=False randomizes all three layers so the
    full softmax-MLP numerics can be checked against a reference.
    """
    def linear(k, fan_in, fan_out):
        bound = 1.0 / jnp.sqrt(float(fan_in))
        return jax.random.uniform(k, (fan_in, fan_out), jnp.float32, -bound, bound)

    k1, k2, k3 = jax.random.split(key, 3)
    w1 = linear(k1, in_channels, num_hidden1)
    w2 = linear(k2, num_hidden1, num_hidden2)
    w3 = linear(k3, num_hidden2, out_channels)
    if faithful:
        w1 = jnp.zeros_like(w1)   # fc1.weight.data.uniform_(0.0, 0.0)
        w3 = jnp.zeros_like(w3)   # fc3.weight.data.uniform_(0.0, 0.0)
    return (w1.astype(dtype), w2.astype(dtype), w3.astype(dtype))


def _reference(x, params):
    """Pure-JAX reference with the same dtype policy (bf16 weights, f32 accum)."""
    w1, w2, w3 = params
    x = x.reshape(x.shape[0], -1).astype(jnp.float32)
    h1 = x @ w1.astype(jnp.float32)
    z = jnp.dot(h1.astype(w2.dtype), w2, preferred_element_type=jnp.float32)
    p = jax.nn.softmax(z, axis=-1)
    return jnp.dot(p.astype(w3.dtype), w3, preferred_element_type=jnp.float32)


if __name__ == "__main__":
    key = jax.random.PRNGKey(0)
    k_params, _ = jax.random.split(key)

    B, C_IN, C_OUT = 2, 4, 4
    # One-hot input rows (the module is a "deep table" for one-hot in/out).
    x = jax.nn.one_hot(jnp.array([1, 3]), C_IN, dtype=jnp.float32)

    # (a) Faithful module init: fc3 weights are zero -> output must be exactly 0.
    params0 = init_params(k_params, C_IN, C_OUT, faithful=True)
    out0 = jax.block_until_ready(deep_table3_forward(x, params0))
    assert out0.shape == (B, C_OUT)
    assert jnp.allclose(out0, 0.0), out0

    # (b) Randomized weights: check the full linear->linear->softmax->linear path.
    params = init_params(k_params, C_IN, C_OUT, faithful=False)
    out = jax.block_until_ready(deep_table3_forward(x, params))
    ref = _reference(x, params)
    assert out.shape == (B, C_OUT)
    assert jnp.allclose(out, ref, atol=1e-4, rtol=1e-4), (out, ref)

    print("KERNEL_OK")
</pallas_src>

<mosaic_0001>
module attributes {stable_mosaic.version = 11 : i64} {
  func.func @_deep_table3_kernel(%arg0: memref<2x4xf32, #tpu.memory_space<vmem>>, %arg1: memref<4x200xbf16, #tpu.memory_space<vmem>>, %arg2: memref<200x100xbf16, #tpu.memory_space<vmem>>, %arg3: memref<100x4xbf16, #tpu.memory_space<vmem>>, %arg4: memref<2x4xf32, #tpu.memory_space<vmem>>) attributes {dimension_semantics = [], scalar_prefetch = 0 : i64, scratch_operands = 0 : i64, tpu.core_type = #tpu.core_type<tc>} {
    %c0 = arith.constant 0 : index
    %c0_0 = arith.constant 0 : index
    %0 = vector.load %arg0[%c0, %c0_0] : memref<2x4xf32, #tpu.memory_space<vmem>>, vector<2x4xf32>
    %c0_1 = arith.constant 0 : index
    %c0_2 = arith.constant 0 : index
    %1 = vector.load %arg1[%c0_1, %c0_2] : memref<4x200xbf16, #tpu.memory_space<vmem>>, vector<4x200xbf16>
    %2 = arith.extf %1 : vector<4x200xbf16> to vector<4x200xf32>
    %3 = vector.extract_strided_slice %0 {offsets = [0, 0], sizes = [2, 1], strides = [1, 1]} : vector<2x4xf32> to vector<2x1xf32>
    %4 = vector.extract_strided_slice %2 {offsets = [0, 0], sizes = [1, 200], strides = [1, 1]} : vector<4x200xf32> to vector<1x200xf32>
    %5 = vector.broadcast %3 : vector<2x1xf32> to vector<2x200xf32>
    %6 = vector.broadcast %4 : vector<1x200xf32> to vector<2x200xf32>
    %7 = arith.mulf %5, %6 : vector<2x200xf32>
    %8 = vector.extract_strided_slice %0 {offsets = [0, 1], sizes = [2, 1], strides = [1, 1]} : vector<2x4xf32> to vector<2x1xf32>
    %9 = vector.extract_strided_slice %2 {offsets = [1, 0], sizes = [1, 200], strides = [1, 1]} : vector<4x200xf32> to vector<1x200xf32>
    %10 = vector.broadcast %8 : vector<2x1xf32> to vector<2x200xf32>
    %11 = vector.broadcast %9 : vector<1x200xf32> to vector<2x200xf32>
    %12 = arith.mulf %10, %11 : vector<2x200xf32>
    %13 = arith.addf %7, %12 : vector<2x200xf32>
    %14 = vector.extract_strided_slice %0 {offsets = [0, 2], sizes = [2, 1], strides = [1, 1]} : vector<2x4xf32> to vector<2x1xf32>
    %15 = vector.extract_strided_slice %2 {offsets = [2, 0], sizes = [1, 200], strides = [1, 1]} : vector<4x200xf32> to vector<1x200xf32>
    %16 = vector.broadcast %14 : vector<2x1xf32> to vector<2x200xf32>
    %17 = vector.broadcast %15 : vector<1x200xf32> to vector<2x200xf32>
    %18 = arith.mulf %16, %17 : vector<2x200xf32>
    %19 = arith.addf %13, %18 : vector<2x200xf32>
    %20 = vector.extract_strided_slice %0 {offsets = [0, 3], sizes = [2, 1], strides = [1, 1]} : vector<2x4xf32> to vector<2x1xf32>
    %21 = vector.extract_strided_slice %2 {offsets = [3, 0], sizes = [1, 200], strides = [1, 1]} : vector<4x200xf32> to vector<1x200xf32>
    %22 = vector.broadcast %20 : vector<2x1xf32> to vector<2x200xf32>
    %23 = vector.broadcast %21 : vector<1x200xf32> to vector<2x200xf32>
    %24 = arith.mulf %22, %23 : vector<2x200xf32>
    %25 = arith.addf %19, %24 : vector<2x200xf32>
    %26 = arith.truncf %25 : vector<2x200xf32> to vector<2x200xbf16>
    %c0_3 = arith.constant 0 : index
    %c0_4 = arith.constant 0 : index
    %27 = vector.load %arg2[%c0_3, %c0_4] : memref<200x100xbf16, #tpu.memory_space<vmem>>, vector<200x100xbf16>
    %cst = arith.constant dense<0.000000e+00> : vector<2x100xf32>
    %28 = tpu.matmul %26, %27, %cst {dimension_numbers = #tpu.dot_dimension_numbers<[1], [0], [0], [1], [0, 0, 1, 1], [], []>} : vector<2x200xbf16>, vector<200x100xbf16>, vector<2x100xf32> -> vector<2x100xf32>
    %cst_5 = arith.constant dense<0xFF800000> : vector<2xf32>
    %29 = vector.multi_reduction <maximumf>, %28, %cst_5 [1] : vector<2x100xf32> to vector<2xf32>
    %30 = vector.shape_cast %29 : vector<2xf32> to vector<2x1xf32>
    %31 = vector.broadcast %30 : vector<2x1xf32> to vector<2x100xf32>
    %32 = arith.subf %28, %31 : vector<2x100xf32>
    %33 = math.exp %32 : vector<2x100xf32>
    %cst_6 = arith.constant dense<0.000000e+00> : vector<2xf32>
    %34 = vector.multi_reduction <add>, %33, %cst_6 [1] : vector<2x100xf32> to vector<2xf32>
    %35 = vector.shape_cast %34 : vector<2xf32> to vector<2x1xf32>
    %36 = vector.broadcast %35 : vector<2x1xf32> to vector<2x100xf32>
    %37 = arith.divf %33, %36 : vector<2x100xf32>
    %38 = arith.truncf %37 : vector<2x100xf32> to vector<2x100xbf16>
    %c0_7 = arith.constant 0 : index
    %c0_8 = arith.constant 0 : index
    %39 = vector.load %arg3[%c0_7, %c0_8] : memref<100x4xbf16, #tpu.memory_space<vmem>>, vector<100x4xbf16>
    %cst_9 = arith.constant dense<0.000000e+00> : vector<2x4xf32>
    %40 = tpu.matmul %38, %39, %cst_9 {dimension_numbers = #tpu.dot_dimension_numbers<[1], [0], [0], [1], [0, 0, 1, 1], [], []>} : vector<2x100xbf16>, vector<100x4xbf16>, vector<2x4xf32> -> vector<2x4xf32>
    %c0_10 = arith.constant 0 : index
    %c0_11 = arith.constant 0 : index
    %41 = vector.load %arg4[%c0_10, %c0_11] : memref<2x4xf32, #tpu.memory_space<vmem>>, vector<2x4xf32>
    tpu.vector_store %arg4[%c0_10, %c0_11], %40 {strides = array<i32>} : memref<2x4xf32, #tpu.memory_space<vmem>>, vector<2x4xf32>,
    return
  }
}

</mosaic_0001>

<bundles_post_ra>
// kernel: tpu_custom_call.1
= control target key start
LH: loop header
LB: loop body
LE: loop exit
PB: predicated region body
PF: predicated region fallthrough
CT: control target
= control target key end

     0   :  { %9 = vsyncpa [#allocation3], 0  ;;  %s577_s0 = inlined_call_operand.vmem [shape: f32[2,4], index: 0, kind: input, shape index: {}]   ;;  %s578_s1 = inlined_call_operand.vmem [shape: bf16[4,200], index: 1, kind: input, shape index: {}]   ;;  %s579_s2 = inlined_call_operand.hbm [shape: bf16[200,100], index: 2, kind: input, shape index: {}]   ;;  %s580_s3 = inlined_call_operand.vmem [shape: bf16[100,4], index: 3, kind: input, shape index: {}]   ;;  %s581_s4 = inlined_call_operand.hbm [shape: f32[2,4], index: 4, kind: output, shape index: {}]  }
   0x1   :  { %10 = vsyncpa [#allocation4], 0  ;;  %s19_s17 = sshll.u32 %s579_s2, 4  ;;  %s509_s18 = smov [#allocation2]   ;;  %s20_s17 = int_to_ptr.hbm [resolvable:$true] %s19_s17 }
   0x2   :  { %s21_s19 = sshll.u32 %s509_s18, 4  ;;  %s510_s20 = smov 64   ;;  %s22_s19 = int_to_ptr.vmem [resolvable:$true] %s21_s19 }
   0x3   :  { %s511_s21 = smov 4  }
   0x4   :  { %27 = dma.hbm_to_vmem [thread:$0]  %s20_s17, 1600, %s22_s19, [#allocation3], %s510_s20, %s510_s20, %s511_s21  }
   0x5   :  { %505 = dma.done.wait [#allocation3], 1600  }
   0x6   :  { %506 = vsyncadd [#allocation3], 4294965696  ;;  %v512_v0 = vmov 0   ;;  %v513_v1 = vmov 2   ;;  %v35_v2 = vld [vmem:[%s577_s0] sm:$0x3] }
   0x7   :  { %448 = vset.pattern.permute.xlu0 %v512_v0  ;;  %450 = vset.pattern.permute.xlu1 %v513_v1  ;;  %v429_v3 = vld [vmem:[#allocation2 + $0x38] sm:$0xff]  ;;  %v428_v4 = vld [vmem:[#allocation2 + $0x30] sm:$0xff]  ;;  %v427_v5 = vld [vmem:[#allocation2 + $0x28] sm:$0xff]  ;;  %v514_v6 = vmov 1   ;;  %v515_v7 = vmov 3   ;;  %vm200_vm0 = vcmask 1043456  }
   0x8   :  { %40 = vperm.xlu0 %448, %v35_v2   ;;  %67 = vperm.xlu1 %450, %v35_v2   ;;  %v120_v8 = vld [vmem:[#allocation2 + $0x60] sm:$0xf]  ;;  %v425_v13 = vld [vmem:[#allocation2 + $0x18] sm:$0xff]  ;;  %v424_v15 = vld [vmem:[#allocation2 + $0x10] sm:$0xff]  ;;  %vm196_vm1 = vcmask 588800   ;;  %vm230_vm2 = vcmask 812032  }
   0x9   :  { %204 = vmatpush.bf16.msra.mxu0 %v429_v3  ;;  %v170_v9 = vunpack.c.l.b16 %v120_v8  ;;  %v426_v11 = vld [vmem:[#allocation2 + $0x20] sm:$0xff]  ;;  %v433_v14 = vld [vmem:[#allocation2 + $0x58] sm:$0xff]  ;;  %v432_v16 = vld [vmem:[#allocation2 + $0x50] sm:$0xff]  ;;  %vm312_vm3 = vcmask 1041408   ;;  %vm308_vm8 = vcmask 818176   ;;  %s338_s14 = sshll.u32 %s581_s4, 4  ;;  %s339_s14 = int_to_ptr.hbm [resolvable:$true] %s338_s14 }
   0xa   :  { %v423_v17 = vld [vmem:[#allocation2 + $0x8] sm:$0xff]  ;;  %v422_v19 = vld [vmem:[#allocation2] sm:$0xff]  ;;  %v268_v1 = vld [vmem:[%s580_s3 + $0x30] sm:$0x3]  ;;  %vm329_vm9 = vcmask 25600  }
   0xb   :  { %v183_v10 = vpack.c.b16 %v170_v9, %v170_v9  ;;  %v431_v18 = vld [vmem:[#allocation2 + $0x48] sm:$0xff]  ;;  %v430_v20 = vld [vmem:[#allocation2 + $0x40] sm:$0xff] }
   0xc   :  { %v36_v21 = vld [vmem:[%s578_s1] sm:$0xf] }
   0xd   :  { %205 = vmatpush.bf16.msra.mxu0 %v428_v4  ;;  %v202_v12 = vsel %vm200_vm0, %v183_v10, 0  ;;  %v37_v22 = vunpack.c.l.bf16 %v36_v21 }
   0xe   :  { %220 = vmatpush.bf16.msra.mxu1 %v202_v12  ;;  %v437_v12 = vld [vmem:[%s580_s3 + $0x18] sm:$0xff] }
   0xf   :  { %v44_v25 = vperm.slane %v37_v22, 0  ;;  %v45_v26 = vperm.slane %v37_v22, 4  ;;  %v56_v27 = vperm.slane %v37_v22, 1  ;;  %v57_v28 = vperm.slane %v37_v22, 5 }
  0x10   :  { %449 = vset.pattern.permute.xlu0 %v514_v6  ;;  %451 = vset.pattern.permute.xlu1 %v515_v7  ;;  %v70_v29 = vperm.slane %v37_v22, 2  ;;  %v71_v30 = vperm.slane %v37_v22, 6  ;;  %v84_v31 = vperm.slane %v37_v22, 3  ;;  %v85_v32 = vperm.slane %v37_v22, 7 }
  0x11   :  { %53 = vperm.xlu0 %449, %v35_v2   ;;  %81 = vperm.xlu1 %451, %v35_v2   ;;  %v48_v33 = vperm.slane %v44_v25, 0  ;;  %v49_v34 = vperm.slane %v45_v26, 0  ;;  %v60_v35 = vperm.slane %v56_v27, 1  ;;  %v61_v36 = vperm.slane %v57_v28, 1 }
  0x12   :  { %206 = vmatpush.bf16.msra.mxu0 %v427_v5  ;;  %221 = vmatpush.bf16.msra.mxu1 %v433_v14  ;;  %v74_v37 = vperm.slane %v70_v29, 2  ;;  %v75_v38 = vperm.slane %v71_v30, 2  ;;  %v88_v39 = vperm.slane %v84_v31, 3  ;;  %v89_v40 = vperm.slane %v85_v32, 3  ;;  %v439_v5 = vld [vmem:[%s580_s3 + $0x28] sm:$0xff] }
  0x13   :  { %v294_v2 = vunpack.c.l.b16 %v268_v1  ;;  %v435_v14 = vld [vmem:[%s580_s3 + $0x8] sm:$0xff] }
  0x15   :  { %v301_v3 = vpack.c.b16 %v294_v2, %v294_v2 }
  0x16   :  { %207 = vmatpush.bf16.msra.mxu0 %v426_v11  ;;  %222 = vmatpush.bf16.msra.mxu1 %v432_v16  ;;  %v438_v11 = vld [vmem:[%s580_s3 + $0x20] sm:$0xff] }
  0x17   :  { %v314_v4 = vsel %vm312_vm3, %v301_v3, 0 }
  0x18   :  { %317 = vmatpush.bf16.msra.mxu2 %v314_v4 }
  0x19   :  { %452 = vset.pattern.permute.xlu0 %v515_v7 }
  0x1a   :  { %208 = vmatpush.bf16.msra.mxu0 %v425_v13  ;;  %223 = vmatpush.bf16.msra.mxu1 %v431_v18  ;;  %v436_v13 = vld [vmem:[%s580_s3 + $0x10] sm:$0xff] }
  0x1c   :  { %318 = vmatpush.bf16.msra.mxu2 %v439_v5 }
  0x1e   :  { %209 = vmatpush.bf16.msra.mxu0 %v424_v15  ;;  %224 = vmatpush.bf16.msra.mxu1 %v430_v20  ;;  %v434_v15 = vld [vmem:[%s580_s3] sm:$0xff]  ;;  %s516_s3 = smov [#allocation5]  }
  0x1f   :  { %s336_s11 = sshll.u32 %s516_s3, 4  ;;  %s337_s11 = int_to_ptr.vmem [resolvable:$true] %s336_s11 }
  0x20   :  { %319 = vmatpush.bf16.msra.mxu2 %v438_v11 }
  0x22   :  { %210 = vmatpush.bf16.msra.mxu0 %v423_v17 }
  0x24   :  { %320 = vmatpush.bf16.msra.mxu2 %v437_v12 }
  0x26   :  { %211 = vmatpush.bf16.msra.mxu0 %v422_v19 }
  0x28   :  { %321 = vmatpush.bf16.msra.mxu2 %v436_v13 }
  0x2c   :  { %322 = vmatpush.bf16.msra.mxu2 %v435_v14 }
  0x30   :  { %323 = vmatpush.bf16.msra.mxu2 %v434_v15 }
  0x7a   :  { %v41_v23 = vpop.permute.xlu0 %40  ;;  %v68_v24 = vpop.permute.xlu1 %67 }
  0x7b   :  { %v50_v43 = vmul.f32 %v48_v33, %v41_v23  ;;  %v51_v44 = vmul.f32 %v49_v34, %v41_v23  ;;  %v76_v47 = vmul.f32 %v74_v37, %v68_v24  ;;  %v77_v48 = vmul.f32 %v75_v38, %v68_v24 }
  0x83   :  { %v54_v41 = vpop.permute.xlu0 %53  ;;  %v82_v42 = vpop.permute.xlu1 %81 }
  0x84   :  { %v62_v45 = vmul.f32 %v60_v35, %v54_v41  ;;  %v63_v46 = vmul.f32 %v61_v36, %v54_v41  ;;  %v90_v51 = vmul.f32 %v88_v39, %v82_v42  ;;  %v91_v52 = vmul.f32 %v89_v40, %v82_v42 }
  0x86   :  { %v64_v49 = vadd.f32 %v62_v45, %v50_v43  ;;  %v65_v50 = vadd.f32 %v63_v46, %v51_v44 }
  0x88   :  { %v79_v53 = vadd.f32 %v77_v48, %v65_v50  ;;  %v78_v54 = vadd.f32 %v76_v47, %v64_v49 }
  0x8a   :  { %v93_v55 = vadd.f32 %v91_v52, %v79_v53  ;;  %v92_v56 = vadd.f32 %v90_v51, %v78_v54 }
  0x8c   :  { %v95_v57 = vpack.c.bf16 %v93_v55, %v93_v55  ;;  %v94_v58 = vpack.c.bf16 %v92_v56, %v92_v56 }
  0x8e   :  { %212 = vmatmul.bf16.vlgmr.msra.gmra.mxu0 %v94_v58  ;;  %396 = vmatmul.msk.bf16.vlgmr.msra.gmra.mxu1 %vm196_vm1, %v95_v57 }
 0x10b   :  { %v213_v59 = vpop.f32.mrf.mxu0  ;;  %v226_v60 = vpop.f32.mrf.mxu1 }
 0x10c   :  { %v227_v61 = vadd.f32 %v226_v60, %v213_v59 }
 0x10e   :  { %v231_v62 = vsel %vm230_vm2, %v227_v61, -inf }
 0x10f   :  { %232 = vmax.xlane.f32.xlu2 %v231_v62 }
 0x113   :  { %v215_v63 = vpop.f32.mrf.mxu0  ;;  %v228_v0 = vpop.f32.mrf.mxu1 }
 0x182   :  { %v233_v6 = vpop.xlane.xlu2 %232 }
 0x183   :  { %v234_v7 = vsub.f32 %v227_v61, %v233_v6 }
 0x185   :  { %v235_v8 = vmul.f32 1.442695, %v234_v7 }
 0x187   :  { %453 = vpow2.f32 %v235_v8 }
 0x18d   :  { %v454_v9 = vpop.eup %453 }
 0x18e   :  { %v237_v10 = vsel %vm230_vm2, %v454_v9, 0.0 }
 0x18f   :  { %238 = vadd.xlane.f32.xlu2 %v237_v10 }
 0x202   :  { %v239_v16 = vpop.xlane.xlu2 %238 }
 0x203   :  { %455 = vrcp.f32 %v239_v16  ;;  %v251_v20 = vand.u32 2147483648, %v239_v16  ;;  %v249_v22 = vand.u32 2147483647, %v239_v16  ;;  %vm245_vm5 = vweird.f32 %v239_v16 }
 0x205   :  { %v252_v24 = vor.u32 1.1754944e-38, %v251_v20  ;;  %vm250_vm7 = vcmp.eq.f32.partialorder %v249_v22, 8.507059e+37 }
 0x209   :  { %v456_v17 = vpop.eup %455 }
 0x20a   :  { %v241_v18 = vmul.f32 %v456_v17, %v239_v16  ;;  %vm246_vm4 = vweird.f32 %v456_v17 }
 0x20b   :  { %vm247_vm6 = vmor %vm245_vm5, %vm246_vm4 }
 0x20c   :  { %v242_v19 = vsub.f32 1.0, %v241_v18 }
 0x20e   :  { %v243_v21 = vmul.f32 %v456_v17, %v242_v19 }
 0x210   :  { %v244_v23 = vadd.f32 %v456_v17, %v243_v21 }
 0x212   :  { %v248_v25 = vsel %vm247_vm6, %v456_v17, %v244_v23 }
 0x213   :  { %v253_v26 = vsel %vm250_vm7, %v252_v24, %v248_v25 }
 0x214   :  { %v254_v27 = vmul.f32 %v454_v9, %v253_v26 }
 0x216   :  { %v255_v28 = vpack.c.bf16 %v254_v27, %v254_v27 }
 0x218   :  { %421 = vmatmul.msk.bf16.vlgmr.msra.gmra.mxu2 %vm308_vm8, %v255_v28 }
 0x29b   :  { %v325_v29 = vpop.f32.mrf.mxu2 }
 0x29c   :  { %330 = vst.msk [vmem:[#allocation5] sm:$0x3] %vm329_vm9, %v325_v29 }
 0x29d   :  { %341 = dma.vmem_to_hbm [thread:$0]  %s337_s11, 32, %s339_s14, [#allocation4]  }
 0x2a3   :  { %v327_v30 = vpop.f32.mrf.mxu2 }
 0x2a4   :  { %507 = dma.done.wait [#allocation4], 32  }
 0x2a5   :  { %508 = vsyncadd [#allocation4], 4294967264 }
 0x2a6   :  { %346 = vsyncpa [#allocation3], 1 }
 0x2a7   :  { %347 = vsyncpa [#allocation4], 1 }

</bundles_post_ra>
